<compile_context>
chip_gen: v6e
topology: v6e:2x2x1
jax: 0.10.0
libtpu: 0.0.40
codegen_flags: <defaults>
</compile_context>

<pallas_src>
import jax
import jax.numpy as jnp
from jax.experimental import pallas as pl
from jax.experimental.pallas import tpu as pltpu


def _moe_ffn_kernel(block_expert_ref,   # scalar prefetch (SMEM): (num_blocks,) int32
                    x_ref,              # (tm, D)          bf16  tokens of this block
                    w13_ref,            # (1, 1, D, 2*th)  bf16  expert up/gate tile
                    w2_ref,             # (1, th, D)       bf16  expert down tile
                    wgt_ref,            # (tm, 1)          f32   routing weight per row
                    o_ref,              # (tm, D)          bf16  written on last H step
                    acc_ref):           # (tm, D)          f32   VMEM scratch accumulator
    del block_expert_ref  # consumed by the index_maps only
    h = pl.program_id(1)
    th = w2_ref.shape[1]

    @pl.when(h == 0)
    def _init():
        acc_ref[...] = jnp.zeros_like(acc_ref)

    x = x_ref[...]                 # (tm, D)
    w13 = w13_ref[0, 0]            # (D, 2*th)
    w2 = w2_ref[0]                 # (th, D)

    mm = (((1,), (0,)), ((), ()))  # canonical (M, K) x (K, N)
    h13 = jax.lax.dot_general(x, w13, mm, preferred_element_type=jnp.float32)
    h1 = h13[:, :th]               # lane-aligned split (th % 128 == 0)
    h3 = h13[:, th:]
    g = (h1 * jax.nn.sigmoid(h1)) * h3           # silu(h1) * h3, f32 (tm, th)

    acc_ref[...] += jax.lax.dot_general(
        g.astype(w2.dtype), w2, mm, preferred_element_type=jnp.float32)

    @pl.when(h == pl.num_programs(1) - 1)
    def _finish():
        # scale each row by its softmax routing weight (padding rows have 0)
        # and write the bf16 output block once.
        o_ref[...] = (acc_ref[...] * wgt_ref[...]).astype(o_ref.dtype)


def _round_up(x, m):
    return ((x + m - 1) // m) * m


def _default_tiles():
    """Per-generation (tm, th) defaults (FLOP/byte crossover vs VMEM budget)."""
    kind = ""
    try:
        kind = jax.devices()[0].device_kind.lower()
    except Exception:
        pass
    if "v5" in kind:
        return 256, 256       # v5e: 16 MiB scoped-VMEM default is tight
    if "v6" in kind:
        return 512, 512       # v6e: 128 MiB VMEM, crossover ~650 FLOP/B
    return 512, 256           # v7x / unknown: 64 MiB physical VMEM per TC


def moe_feedforward(x, gate_w, w1, w2, w3, num_activated=2, *, tm=None, th=None):
    """Pallas implementation of MOEFeedForward.forward.  Returns (T, D) f32."""
    D = x.shape[-1]
    x2d = x.reshape(-1, D).astype(jnp.float32)
    T = x2d.shape[0]
    E, H, _ = w1.shape
    A = num_activated

    tm_def, th_def = _default_tiles()
    tm = tm_def if tm is None else tm
    th = th_def if th is None else th

    # clamp tiles for small (decode-sized) batches / small models.
    tm = max(16, min(_round_up(tm, 16), _round_up(T * A, 16)))
    th = min(th, H)
    assert D % 128 == 0, D
    assert H % th == 0, (H, th)
    assert th % 128 == 0, th      # keeps the h13 split lane-aligned
    assert tm % 16 == 0, tm       # bf16 sublane packing

    # --- routing: tiny gate GEMM + top-k + softmax left to XLA ----------------
    # TODO(synk): torch.topk tie-breaking may differ from jax.lax.top_k on ties.
    scores = jnp.dot(x2d, gate_w.T, precision=jax.lax.Precision.HIGHEST)   # (T, E)
    expert_weights, expert_indices = jax.lax.top_k(scores, A)              # (T, A)
    expert_weights = jax.nn.softmax(expert_weights, axis=-1).astype(jnp.float32)

    # --- sort (token, expert) assignments expert-major; pad each expert group
    #     to a multiple of tm so every kernel block maps to exactly one expert.
    flat_expert = expert_indices.reshape(-1).astype(jnp.int32)             # (T*A,)
    flat_token = jnp.arange(T * A, dtype=jnp.int32) // A                   # (T*A,)
    flat_weight = expert_weights.reshape(-1)                               # (T*A,)

    order = jnp.argsort(flat_expert)
    sorted_expert = flat_expert[order]
    sorted_token = flat_token[order]
    sorted_weight = flat_weight[order]

    counts = jnp.bincount(sorted_expert, length=E).astype(jnp.int32)
    padded_counts = ((counts + tm - 1) // tm) * tm
    group_starts = jnp.concatenate(
        [jnp.zeros((1,), jnp.int32), jnp.cumsum(counts)[:-1].astype(jnp.int32)])
    padded_starts = jnp.concatenate(
        [jnp.zeros((1,), jnp.int32), jnp.cumsum(padded_counts)[:-1].astype(jnp.int32)])
    padded_ends = padded_starts + padded_counts

    P = pl.cdiv(T * A + E * (tm - 1), tm) * tm      # static padded capacity
    num_blocks = P // tm

    rank = jnp.arange(T * A, dtype=jnp.int32) - group_starts[sorted_expert]
    pos = padded_starts[sorted_expert] + rank        # (T*A,) positions in [0, P)
    padded_token = jnp.zeros((P,), jnp.int32).at[pos].set(sorted_token)
    padded_weight = jnp.zeros((P,), jnp.float32).at[pos].set(sorted_weight)

    # block -> expert map (blocks past the last real group are pure padding:
    # their rows are zero and carry weight 0, so clamping to E-1 is harmless).
    block_expert = jnp.searchsorted(
        padded_ends, jnp.arange(num_blocks, dtype=jnp.int32) * tm, side='right')
    block_expert = jnp.minimum(block_expert, E - 1).astype(jnp.int32)

    # --- kernel operands ------------------------------------------------------
    # Padding rows are ZERO (not token-0 copies): no inf*0 -> NaN hazard, and
    # they contribute exact zeros to the scatter-add.
    # TODO(synk): the (P, D) gather could be done in-kernel with a manual DMA
    # gather to save one HBM round trip of duplicated activations.
    x_sorted = jnp.zeros((P, D), jnp.bfloat16).at[pos].set(
        x2d[sorted_token].astype(jnp.bfloat16))
    w_scale = padded_weight.reshape(P, 1)                                   # f32

    nh = H // th
    # Stack w1/w3 per-H-tile so a single (D, 2*th) DMA feeds one fused MXU
    # pass, and pre-transpose so both matmuls are canonical (M,K)x(K,N).
    w13 = jnp.concatenate(
        [w1.reshape(E, nh, th, D), w3.reshape(E, nh, th, D)], axis=2)       # (E, nh, 2*th, D)
    w13t = jnp.swapaxes(w13, 2, 3).astype(jnp.bfloat16)                     # (E, nh, D, 2*th)
    w2b = w2.astype(jnp.bfloat16)                                           # (E, H, D)

    # explicit VMEM budget: double-buffered blocks + f32 accumulator + headroom.
    blk_bytes = (2 * tm * D * 2            # x (bf16, double-buffered)
                 + 2 * D * (2 * th) * 2    # fused w13 tile
                 + 2 * th * D * 2          # w2 tile
                 + 2 * tm * 4              # routing weights
                 + 2 * tm * D * 2          # bf16 output block
                 + tm * D * 4)             # f32 accumulator scratch
    vmem_limit = int(min(max(blk_bytes + (8 << 20), 32 << 20), 64 << 20))

    grid_spec = pltpu.PrefetchScalarGridSpec(
        num_scalar_prefetch=1,
        grid=(num_blocks, nh),
        in_specs=[
            pl.BlockSpec((tm, D), lambda b, h, be: (b, 0)),
            pl.BlockSpec((1, 1, D, 2 * th), lambda b, h, be: (be[b], h, 0, 0)),
            pl.BlockSpec((1, th, D), lambda b, h, be: (be[b], h, 0)),
            pl.BlockSpec((tm, 1), lambda b, h, be: (b, 0)),
        ],
        out_specs=pl.BlockSpec((tm, D), lambda b, h, be: (b, 0)),
        scratch_shapes=[pltpu.VMEM((tm, D), jnp.float32)],
    )

    y = pl.pallas_call(
        _moe_ffn_kernel,
        grid_spec=grid_spec,
        out_shape=jax.ShapeDtypeStruct((P, D), jnp.bfloat16),
        compiler_params=pltpu.CompilerParams(
            dimension_semantics=("parallel", "arbitrary"),
            vmem_limit_bytes=vmem_limit),
    )(block_expert, x_sorted, w13t, w2b, w_scale)

    # un-permute: scatter-add per-assignment outputs back to tokens.
    # padding rows are exact zeros, so they contribute nothing.
    out = jnp.zeros((T, D), jnp.float32).at[padded_token].add(y.astype(jnp.float32))
    return out


def moe_feedforward_ref(x, gate_w, w1, w2, w3, num_activated=2):
    """Pure-JAX f32 reference mirroring the PyTorch forward exactly."""
    hi = jax.lax.Precision.HIGHEST
    D = x.shape[-1]
    x2d = x.reshape(-1, D).astype(jnp.float32)
    scores = jnp.einsum('td,ed->te', x2d, gate_w, precision=hi)
    ew, ei = jax.lax.top_k(scores, num_activated)
    ew = jax.nn.softmax(ew, axis=-1)
    w1g = jnp.swapaxes(w1[ei], -1, -2)   # (T, A, D, H)
    w3g = jnp.swapaxes(w3[ei], -1, -2)   # (T, A, D, H)
    w2g = w2[ei]                         # (T, A, H, D)
    x1 = jax.nn.silu(jnp.einsum('ti,taio->tao', x2d, w1g, precision=hi))
    x3 = jnp.einsum('ti,taio->tao', x2d, w3g, precision=hi)
    eo = jnp.einsum('tao,taoi->tai', x1 * x3, w2g, precision=hi)
    return jnp.einsum('tai,ta->ti', eo, ew, precision=hi)


if __name__ == "__main__":
    D = 128        # model dim
    H = 256        # ffn hidden dim
    E = 8          # num_experts
    A = 2          # num_activated_experts (top-2)
    B, S = 2, 4    # batch, seq  -> T = 8 tokens

    key = jax.random.PRNGKey(0)
    kx, kg, k1, k2, k3 = jax.random.split(key, 5)
    x = jax.random.normal(kx, (B, S, D), dtype=jnp.float32)
    gate_w = jax.random.normal(kg, (E, D), dtype=jnp.float32) * 0.02
    w1 = jax.random.normal(k1, (E, H, D), dtype=jnp.float32)   # torch.randn layout (E, H, D)
    w2 = jax.random.normal(k2, (E, H, D), dtype=jnp.float32)
    w3 = jax.random.normal(k3, (E, H, D), dtype=jnp.float32)

    out = jax.block_until_ready(moe_feedforward(x, gate_w, w1, w2, w3, A))
    ref = moe_feedforward_ref(x, gate_w, w1, w2, w3, A)

    assert out.shape == (B * S, D), out.shape
    # bf16 MXU operands / bf16 output with f32 accumulation: relative L2 norm.
    rel_l2 = float(jnp.linalg.norm(out - ref) / (jnp.linalg.norm(ref) + 1e-6))
    assert rel_l2 < 2e-2, rel_l2
    print("KERNEL_OK")
</pallas_src>

<mosaic_0001>
module attributes {stable_mosaic.version = 11 : i64} {
  func.func @_moe_ffn_kernel(%arg0: i32, %arg1: i32, %arg2: memref<9xi32, #tpu.memory_space<smem>>, %arg3: memref<16x128xbf16, #tpu.memory_space<vmem>>, %arg4: memref<1x1x128x512xbf16, #tpu.memory_space<vmem>>, %arg5: memref<1x256x128xbf16, #tpu.memory_space<vmem>>, %arg6: memref<16x1xf32, #tpu.memory_space<vmem>>, %arg7: memref<16x128xbf16, #tpu.memory_space<vmem>>, %arg8: memref<16x128xf32, #tpu.memory_space<vmem>>) attributes {dimension_semantics = [#tpu.dimension_semantics<parallel>, #tpu.dimension_semantics<arbitrary>], iteration_bounds = array<i64: 9, 1>, scalar_prefetch = 1 : i64, scratch_operands = 1 : i64, tpu.core_type = #tpu.core_type<tc>, window_params = [{transform_indices = @transform_0, window_bounds = array<i64: 16, 128>}, {transform_indices = @transform_1, window_bounds = array<i64: 1, 1, 128, 512>}, {transform_indices = @transform_2, window_bounds = array<i64: 1, 256, 128>}, {transform_indices = @transform_3, window_bounds = array<i64: 16, 1>}, {transform_indices = @transform_4, window_bounds = array<i64: 16, 128>}]} {
    %c0_i32 = arith.constant 0 : i32
    %0 = arith.cmpi eq, %arg1, %c0_i32 : i32
    %1 = arith.extui %0 : i1 to i32
    %c0_i32_0 = arith.constant 0 : i32
    %2 = arith.cmpi ne, %1, %c0_i32_0 : i32
    scf.if %2 {
      %cst_17 = arith.constant 0.000000e+00 : f32
      %26 = vector.broadcast %cst_17 : f32 to vector<16x128xf32>
      %c0_18 = arith.constant 0 : index
      %c0_19 = arith.constant 0 : index
      %27 = vector.load %arg8[%c0_18, %c0_19] : memref<16x128xf32, #tpu.memory_space<vmem>>, vector<16x128xf32>
      tpu.vector_store %arg8[%c0_18, %c0_19], %26 {strides = array<i32>} : memref<16x128xf32, #tpu.memory_space<vmem>>, vector<16x128xf32>,
    } else {
    }
    %c0 = arith.constant 0 : index
    %c0_1 = arith.constant 0 : index
    %3 = vector.load %arg3[%c0, %c0_1] : memref<16x128xbf16, #tpu.memory_space<vmem>>, vector<16x128xbf16>
    %c0_2 = arith.constant 0 : index
    %c0_3 = arith.constant 0 : index
    %c0_4 = arith.constant 0 : index
    %c0_5 = arith.constant 0 : index
    %4 = vector.load %arg4[%c0_2, %c0_3, %c0_4, %c0_5] : memref<1x1x128x512xbf16, #tpu.memory_space<vmem>>, vector<1x1x128x512xbf16>
    %5 = vector.shape_cast %4 : vector<1x1x128x512xbf16> to vector<128x512xbf16>
    %c0_6 = arith.constant 0 : index
    %c0_7 = arith.constant 0 : index
    %c0_8 = arith.constant 0 : index
    %6 = vector.load %arg5[%c0_6, %c0_7, %c0_8] : memref<1x256x128xbf16, #tpu.memory_space<vmem>>, vector<1x256x128xbf16>
    %7 = vector.shape_cast %6 : vector<1x256x128xbf16> to vector<256x128xbf16>
    %cst = arith.constant dense<0.000000e+00> : vector<16x512xf32>
    %8 = tpu.matmul %3, %5, %cst {dimension_numbers = #tpu.dot_dimension_numbers<[1], [0], [0], [1], [0, 0, 1, 1], [], []>} : vector<16x128xbf16>, vector<128x512xbf16>, vector<16x512xf32> -> vector<16x512xf32>
    %9 = vector.extract_strided_slice %8 {offsets = [0, 0], sizes = [16, 256], strides = [1, 1]} : vector<16x512xf32> to vector<16x256xf32>
    %10 = vector.extract_strided_slice %8 {offsets = [0, 256], sizes = [16, 256], strides = [1, 1]} : vector<16x512xf32> to vector<16x256xf32>
    %11 = arith.negf %9 : vector<16x256xf32>
    %12 = math.exp %11 : vector<16x256xf32>
    %cst_9 = arith.constant 1.000000e+00 : f32
    %13 = vector.broadcast %cst_9 : f32 to vector<16x256xf32>
    %14 = arith.addf %13, %12 : vector<16x256xf32>
    %15 = arith.divf %13, %14 : vector<16x256xf32>
    %16 = arith.mulf %9, %15 : vector<16x256xf32>
    %17 = arith.mulf %16, %10 : vector<16x256xf32>
    %c0_10 = arith.constant 0 : index
    %c0_11 = arith.constant 0 : index
    %18 = vector.load %arg8[%c0_10, %c0_11] : memref<16x128xf32, #tpu.memory_space<vmem>>, vector<16x128xf32>
    %19 = arith.truncf %17 : vector<16x256xf32> to vector<16x256xbf16>
    %cst_12 = arith.constant dense<0.000000e+00> : vector<16x128xf32>
    %20 = tpu.matmul %19, %7, %cst_12 {dimension_numbers = #tpu.dot_dimension_numbers<[1], [0], [0], [1], [0, 0, 1, 1], [], []>} : vector<16x256xbf16>, vector<256x128xbf16>, vector<16x128xf32> -> vector<16x128xf32>
    %21 = arith.addf %18, %20 : vector<16x128xf32>
    %c0_13 = arith.constant 0 : index
    %c0_14 = arith.constant 0 : index
    %22 = vector.load %arg8[%c0_13, %c0_14] : memref<16x128xf32, #tpu.memory_space<vmem>>, vector<16x128xf32>
    tpu.vector_store %arg8[%c0_13, %c0_14], %21 {strides = array<i32>} : memref<16x128xf32, #tpu.memory_space<vmem>>, vector<16x128xf32>,
    %c0_i32_15 = arith.constant 0 : i32
    %23 = arith.cmpi eq, %arg1, %c0_i32_15 : i32
    %24 = arith.extui %23 : i1 to i32
    %c0_i32_16 = arith.constant 0 : i32
    %25 = arith.cmpi ne, %24, %c0_i32_16 : i32
    scf.if %25 {
      %c0_17 = arith.constant 0 : index
      %c0_18 = arith.constant 0 : index
      %26 = vector.load %arg8[%c0_17, %c0_18] : memref<16x128xf32, #tpu.memory_space<vmem>>, vector<16x128xf32>
      %c0_19 = arith.constant 0 : index
      %c0_20 = arith.constant 0 : index
      %27 = vector.load %arg6[%c0_19, %c0_20] : memref<16x1xf32, #tpu.memory_space<vmem>>, vector<16x1xf32>
      %28 = vector.broadcast %27 : vector<16x1xf32> to vector<16x128xf32>
      %29 = arith.mulf %26, %28 : vector<16x128xf32>
      %30 = arith.truncf %29 : vector<16x128xf32> to vector<16x128xbf16>
      %c0_21 = arith.constant 0 : index
      %c0_22 = arith.constant 0 : index
      %31 = vector.load %arg7[%c0_21, %c0_22] : memref<16x128xbf16, #tpu.memory_space<vmem>>, vector<16x128xbf16>
      tpu.vector_store %arg7[%c0_21, %c0_22], %30 {strides = array<i32>} : memref<16x128xbf16, #tpu.memory_space<vmem>>, vector<16x128xbf16>,
    } else {
    }
    return
  }
  func.func @transform_0(%arg0: i32, %arg1: i32, %arg2: memref<9xi32, #tpu.memory_space<smem>>) -> (i32, i32) {
    %c0_i32 = arith.constant 0 : i32
    %c0_i32_0 = arith.constant 0 : i32
    return %arg0, %c0_i32 : i32, i32
  }
  func.func @transform_1(%arg0: i32, %arg1: i32, %arg2: memref<9xi32, #tpu.memory_space<smem>>) -> (i32, i32, i32, i32) {
    %0 = arith.index_cast %arg0 : i32 to index
    %1 = memref.load %arg2[%0] : memref<9xi32, #tpu.memory_space<smem>>
    %c0_i32 = arith.constant 0 : i32
    %c0_i32_0 = arith.constant 0 : i32
    %c0_i32_1 = arith.constant 0 : i32
    return %1, %arg1, %c0_i32, %c0_i32_0 : i32, i32, i32, i32
  }
  func.func @transform_2(%arg0: i32, %arg1: i32, %arg2: memref<9xi32, #tpu.memory_space<smem>>) -> (i32, i32, i32) {
    %0 = arith.index_cast %arg0 : i32 to index
    %1 = memref.load %arg2[%0] : memref<9xi32, #tpu.memory_space<smem>>
    %c0_i32 = arith.constant 0 : i32
    %c0_i32_0 = arith.constant 0 : i32
    return %1, %arg1, %c0_i32 : i32, i32, i32
  }
  func.func @transform_3(%arg0: i32, %arg1: i32, %arg2: memref<9xi32, #tpu.memory_space<smem>>) -> (i32, i32) {
    %c0_i32 = arith.constant 0 : i32
    %c0_i32_0 = arith.constant 0 : i32
    return %arg0, %c0_i32 : i32, i32
  }
  func.func @transform_4(%arg0: i32, %arg1: i32, %arg2: memref<9xi32, #tpu.memory_space<smem>>) -> (i32, i32) {
    %c0_i32 = arith.constant 0 : i32
    %c0_i32_0 = arith.constant 0 : i32
    return %arg0, %c0_i32 : i32, i32
  }
}

</mosaic_0001>

<bundles_post_ra>
// kernel: tpu_custom_call.1
= control target key start
LH: loop header
LB: loop body
LE: loop exit
PB: predicated region body
PF: predicated region fallthrough
CT: control target
= control target key end

     0   :  { %s1961_s0 = inlined_call_operand.vmem [shape: s32[9], index: 0, kind: input, shape index: {}]   ;;  %s1962_s1 = inlined_call_operand.vmem [shape: bf16[144,128], index: 1, kind: input, shape index: {}]   ;;  %s1963_s2 = inlined_call_operand.hbm [shape: bf16[8,1,128,512], index: 2, kind: input, shape index: {}]   ;;  %s1964_s3 = inlined_call_operand.hbm [shape: bf16[8,256,128], index: 3, kind: input, shape index: {}]   ;;  %s1965_s4 = inlined_call_operand.vmem [shape: f32[144,1], index: 4, kind: input, shape index: {}]   ;;  %s1966_s5 = inlined_call_operand.hbm [shape: bf16[144,128], index: 5, kind: output, shape index: {}]  }
   0x1   :  { %1979 = sst [smem:[#allocation26_spill]] %s1966_s5  ;;  %s10_s20 = sshll.u32 %s1961_s0, 4  ;;  %s11_s20 = int_to_ptr.vmem [resolvable:$true] %s10_s20 }
   0x2   :  { %s1339_s21 = scalar_lea.vmem %s11_s20, 16  ;;  %p1344_p1 = scmp.lt.s32.totalorder %s11_s20, %s11_s20 }
   0x3   :  { %p1340_p0 = scmp.ne.s32.totalorder %s11_s20, %s1339_s21  ;;  %p1345_p2 = scmp.lt.s32.totalorder %s1339_s21, %s1339_s21 }
   0x5   :  { %p1346_p3 = por %p1345_p2, %p1344_p1 }
   0x7   :  { %p1347_p4 = pnand %p1346_p3, %p1340_p0 }
   0x9   :  { %1350 = shalt.err (!%p1347_p4)  }
   0xa   :  { %s1543_s22 = smov [#allocation4]  }
   0xb   :  { %13 = dma.vmem_to_smem %s11_s20, 16, %s1543_s22, [#allocation3] }
   0xc   :  { %1481 = dma.done.wait [#allocation3], 16 }
   0xd   :  { %1482 = vsyncadd [#allocation3], 4294967280 }
   0xe   :  { %15 = sfence }
   0xf   :  { %16 = vsyncpa [#allocation6], 0 }
  0x10   :  { %18 = vsyncpa [#allocation6 + $0x1], 0 }
  0x11   :  { %19 = vsyncpa [#allocation9], 0 }
  0x12   :  { %21 = vsyncpa [#allocation9 + $0x1], 0 }
  0x13   :  { %22 = vsyncpa [#allocation7], 0 }
  0x14   :  { %24 = vsyncpa [#allocation7 + $0x1], 0  ;;  %s1587_s0 = smov 0   ;;  %s1589_s23 = smov 0  }
  0x15   :  { %s1591_s24 = smov 0   ;;  %s1593_s25 = smov 0  }
  0x16   :  { %s1595_s26 = smov 0   ;;  %s1597_s27 = smov 0  }
  0x17   :  { %s1599_s28 = smov 0   ;;  %s1601_s29 = smov 0  }
  0x18   :  { %s1603_s30 = smov 0   ;;  %s1605_s6 = smov 0  }
  0x19   :  { %s1607_s7 = smov 0   ;;  %s1609_s8 = smov 0  }
  0x1a LB: > { %1980 = sst [smem:[#allocation19_spill]] %s1497_s0  ;;  %s1016_s9 = sadd.s32 4294967295, %s1541_s8   ;;  %s1541_s8 = sphi %s1609_s8, %s30_s8   ;;  %s1537_s7 = sphi %s1607_s7, %s2022_s7   ;;  %s1533_s6 = sphi %s1605_s6, %s2021_s6   ;;  %s1529_s30 = sphi %s1603_s30, %s2012_s30   ;;  %s1525_s29 = sphi %s1601_s29, %s2020_s29   ;;  %s1521_s28 = sphi %s1599_s28, %s2019_s28   ;;  %s1517_s27 = sphi %s1597_s27, %s2018_s27   ;;  %s1513_s26 = sphi %s1595_s26, %s2017_s26   ;;  %s1509_s25 = sphi %s1593_s25, %s2016_s25   ;;  %s1505_s24 = sphi %s1591_s24, %s2010_s24   ;;  %s1501_s23 = sphi %s1589_s23, %s2015_s23   ;;  %s1497_s0 = sphi %s1587_s0, %s2014_s0  }
  0x1b   : > { %1981 = sst [smem:[#allocation20_spill]] %s1505_s24  ;;  %s1017_s10 = sadd.s32 4294967294, %s1541_s8  }
  0x1c   : > { %1982 = sst [smem:[#allocation21_spill]] %s1529_s30  ;;  %s42_s11 = sadd.s32 1, %s1537_s7 }
  0x1d   : > { %s72_s12 = sld [smem:[#allocation4 + %s1537_s7]]  ;;  %p44_p5 = scmp.ge.s32.totalorder %s42_s11, 9 }
  0x1e   : > { %s79_s13 = sadd.s32 1, %s1529_s30  ;;  %p86_p6 = scmp.ne.s32.totalorder %s1529_s30, %s1525_s29 }
  0x1f   : > { %p1973_p7 = scmp.eq.s32.totalorder %s1541_s8, 0  ;;  %s2024_s11 = smov (%p44_p5, %s42_s11), 0 }
  0x20   : > { %1983 = sst [smem:[#allocation22_spill]] %s2024_s11  ;;  %p92_p9 = scmp.ne.s32.totalorder %s1525_s29, %s1521_s28 }
  0x21   : > { %p1657_p8 = por %p1973_p7, %p86_p6  ;;  %s73_s15 = sld [smem:[#allocation4 + %s2024_s11]] }
  0x22   : > { %p1663_p10 = scmp.eq.s32.totalorder %s1016_s9, 0  ;;  %s158_s17 = ssub.s32 %s1537_s7, %s2024_s11 }
  0x23   : > { %s161_s18 = sadd.s32 1, %s1505_s24  ;;  %p159_p12 = scmp.eq.s32.totalorder %s158_s17, 0 }
  0x24   : > { %s1985_s16 = scalar_select %p1663_p10, 1, 0 }
  0x25   : > { %p1672_p11 = por %p1663_p10, %p92_p9  ;;  %p171_p13 = scmp.ne.s32.totalorder %s1505_s24, %s1501_s23 }
  0x26   : > { %p172_p0 = scmp.eq.s32.totalorder %s1016_s9, 8  ;;  %p177_p2 = scmp.ne.s32.totalorder %s1501_s23, %s1497_s0 }
  0x27   : > { %s1986_s19 = scalar_select %p1672_p11, 1, 0 }
  0x28   : > { %s1679_s20 = scalar_select %p159_p12, %s1505_s24, %s161_s18  }
  0x29   : > { %p1681_p1 = por %p172_p0, %p171_p13  ;;  %s74_s22 = ssub.s32 %s72_s12, %s73_s15 }
  0x2a   : > { %1987 = sst [smem:[#allocation23_spill]] %s1679_s20  ;;  %p178_p3 = scmp.eq.s32.totalorder %s1017_s10, 8 }
  0x2b   : > { %s1988_s21 = scalar_select %p1681_p1, 1, 0 }
  0x2c   : > { %p77_p4 = scmp.eq.s32.totalorder %s74_s22, 0  ;;  %p1687_p5 = por %p178_p3, %p177_p2 }
  0x2d   : > { %p1972_p6 = scmp.lt.s32.totalorder %s1541_s8, 9  ;;  %s207_s9 = sand.u32 1, %s1529_s30  }
  0x2e   : > { %s1989_s28 = scalar_select %p1687_p5, 1, 0 }
  0x2f   : > { %s1693_s17 = scalar_select %p77_p4, %s1529_s30, %s79_s13  }
  0x30   : > { %1990 = sst [smem:[#allocation24_spill]] %s1989_s28  ;;  %p1700_p9 = pnand %p1972_p6, %p1657_p8 }
  0x31   : > { %1991 = sst [smem:[#allocation25_spill]] %s1693_s17  ;;  %s1020_s10 = sshll.u32 %s207_s9, 8 }
  0x32   : > { %s1126_s12 = scalar_select %p1657_p8, [#allocation4], [#allocation11] }
  0x33   : > { %s1127_s15 = scalar_select %p1657_p8, %s1537_s7, 0 }
  0x34   : > { %s2026_s12 = smov (!%p1972_p6, %s1126_s12), [#allocation13]  ;;  %s211_s13 = scalar_lea.vmem [#allocation5], %s1020_s10 }
  0x35   : > { %s2028_s15 = smov (!%p1972_p6, %s1127_s15), 0  ;;  %s221_s22 = sshll.u32 %s211_s13, 4  ;;  %s1713_s22 = int_to_ptr.vmem [resolvable:$true] %s221_s22 }
  0x36   : > { %s212_s17 = sld [smem:[%s2026_s12 + %s2028_s15]]  ;;  %p1026_p12 = scmp.ge.s32.totalorder %s1541_s8, 1 }
  0x37   : > { %p262_p13 = scmp.lt.s32.totalorder %s1541_s8, 10  ;;  %s1722_s24 = sld [smem:[#allocation4 + %s1537_s7]] }
  0x38   : > { %s1730_s10 = sld [smem:[#allocation4 + %s2024_s11]]  ;;  %s1732_s12 = scalar_lea.sflag [#allocation6], %s207_s9 }
  0x39   : > { %p1717_p0 = pnand %p1026_p12, %p262_p13  ;;  %p1353_p2 = pneg %p1700_p9 }
  0x3a   : > { %s1356_s5 = scalar_lea.hbm %s1963_s2, 32768 }
  0x3b   : > { %s1993_s30 = scalar_select %p1717_p0, 1, 0 }
  0x3c   : > { %s1094_s20 = sshll.u32 %s212_s17, 12 }
  0x3d   : > { %s1727_s0 = scalar_lea.hbm %s1963_s2, %s1094_s20 }
  0x3e   : > { %s1351_s15 = scalar_lea.hbm %s1727_s0, 4096  ;;  %p1357_p12 = scmp.lt.s32.totalorder %s1727_s0, %s1963_s2 }
  0x3f   : > { %p1352_p8 = scmp.ne.s32.totalorder %s1727_s0, %s1351_s15  ;;  %p1358_p13 = scmp.lt.s32.totalorder %s1356_s5, %s1351_s15 }
  0x41   : > { %p1354_p3 = pnand %p1353_p2, %p1352_p8  ;;  %p1359_p6 = por %p1358_p13, %p1357_p12 }
  0x43   : > { %p1355_p4 = pneg %p1354_p3 }
  0x45   : > { %p1360_p7 = pnand %p1359_p6, %p1355_p4 }
  0x47   : > { %1363 = shalt.err (!%p1360_p7)
}
  0x48   : > { %s1364_s9 = scalar_lea.vmem %s1713_s22, 4096  ;;  %s1544_s14 = smov [#allocation5]  }
  0x49   : > { %p1365_p5 = scmp.ne.s32.totalorder %s1713_s22, %s1364_s9  ;;  %s1369_s11 = sshll.u32 %s1544_s14, 4  ;;  %s1370_s11 = int_to_ptr.vmem [resolvable:$false] %s1369_s11 }
  0x4a   : > { %s1371_s17 = scalar_lea.vmem %s1370_s11, 8192  ;;  %p1372_p3 = scmp.lt.s32.totalorder %s1713_s22, %s1370_s11 }
  0x4b   : > { %p1367_p1 = pnand %p1365_p5, %p1353_p2  ;;  %p1373_p11 = scmp.lt.s32.totalorder %s1371_s17, %s1364_s9 }
  0x4d   : > { %p1368_p8 = pneg %p1367_p1  ;;  %p1374_p0 = por %p1373_p11, %p1372_p3 }
  0x4f   : > { %p1375_p10 = pnand %p1374_p0, %p1368_p8 }
  0x51   : > { %1378 = shalt.err (!%p1375_p10)
}
  0x52   : > { %s1545_s5 = smov 256   ;;  %s1546_s11 = smov 16  }
  0x53   : > { %1141 = dma.hbm_to_vmem [thread:$0]  (!%p1700_p9), %s1727_s0, 4096, %s1713_s22, %s1732_s12, %s1545_s5, %s1545_s5, %s1546_s11  }
  0x54   : > { %p116_p7 = scmp.ne.s32.totalorder %s1517_s27, %s1513_s26  ;;  %p122_p10 = scmp.ne.s32.totalorder %s1513_s26, %s1509_s25 }
  0x55   : > { %s231_s15 = sand.u32 1, %s1517_s27   ;;  %p1994_p11 = scmp.eq.s32.totalorder %s1541_s8, 0 }
  0x56   : > { %p1995_p5 = scmp.ne.s32.totalorder %s1985_s16, 0  ;;  %s1023_s28 = sshll.u32 %s231_s15, 7 }
  0x57   : > { %p118_p1 = por %p116_p7, %p1994_p11  ;;  %s104_s20 = ssub.s32 %s1722_s24, %s1730_s10 }
  0x58   : > { %p1762_p6 = por %p122_p10, %p1995_p5  ;;  %s109_s9 = sadd.s32 1, %s1517_s27 }
  0x59   : > { %p107_p0 = scmp.eq.s32.totalorder %s104_s20, 0  ;;  %p1997_p2 = scmp.lt.s32.totalorder %s1541_s8, 9 }
  0x5a   : > { %s1996_s13 = scalar_select %p1762_p6, 1, 0 }
  0x5b   : > { %s1129_s14 = scalar_select %p118_p1, [#allocation4], [#allocation12] }
  0x5c   : > { %s1770_s17 = scalar_select %p107_p0, %s1517_s27, %s109_s9  }
  0x5d   : > { %s1130_s18 = scalar_select %p118_p1, %s1537_s7, 0 }
  0x5e   : > { %s2030_s14 = smov (!%p1997_p2, %s1129_s14), [#allocation14]  ;;  %p1998_p9 = pmov %p1997_p2 }
  0x5f   : > { %p1999_p4 = pmov %p1997_p2  ;;  %s235_s16 = scalar_lea.vmem [#allocation8], %s1023_s28 }
  0x60   : > { %s2032_s18 = smov (!%p1998_p9, %s1130_s18), 0  ;;  %s245_s22 = sshll.u32 %s235_s16, 4  ;;  %s1783_s22 = int_to_ptr.vmem [resolvable:$true] %s245_s22 }
  0x61   : > { %p1779_p12 = pnand %p1999_p4, %p118_p1  ;;  %s236_s25 = sld [smem:[%s2030_s14 + %s2032_s18]] }
  0x62   : > { %s1790_s11 = scalar_lea.sflag [#allocation9], %s231_s15  ;;  %s1384_s14 = scalar_lea.hbm %s1964_s3, 16384 }
  0x63   : > { %p1381_p8 = pneg %p1779_p12 }
  0x67   : > { %s1095_s24 = sshll.u32 %s236_s25, 11 }
  0x68   : > { %s1788_s5 = scalar_lea.hbm %s1964_s3, %s1095_s24 }
  0x69   : > { %s1379_s20 = scalar_lea.hbm %s1788_s5, 2048  ;;  %p1385_p10 = scmp.lt.s32.totalorder %s1788_s5, %s1964_s3 }
  0x6a   : > { %p1380_p13 = scmp.ne.s32.totalorder %s1788_s5, %s1379_s20  ;;  %p1386_p11 = scmp.lt.s32.totalorder %s1384_s14, %s1379_s20 }
  0x6c   : > { %p1382_p3 = pnand %p1381_p8, %p1380_p13  ;;  %p1387_p1 = por %p1386_p11, %p1385_p10 }
  0x6e   : > { %p1383_p7 = pneg %p1382_p3 }
  0x70   : > { %p1388_p5 = pnand %p1387_p1, %p1383_p7 }
  0x72   : > { %1391 = shalt.err (!%p1388_p5)
}
  0x73   : > { %s1392_s15 = scalar_lea.vmem %s1783_s22, 2048  ;;  %s1547_s16 = smov [#allocation8]  }
  0x74   : > { %p1393_p0 = scmp.ne.s32.totalorder %s1783_s22, %s1392_s15  ;;  %s1397_s24 = sshll.u32 %s1547_s16, 4  ;;  %s1398_s24 = int_to_ptr.vmem [resolvable:$false] %s1397_s24 }
  0x75   : > { %s1399_s10 = scalar_lea.vmem %s1398_s24, 4096  ;;  %p1400_p4 = scmp.lt.s32.totalorder %s1783_s22, %s1398_s24 }
  0x76   : > { %p1395_p2 = pnand %p1393_p0, %p1381_p8  ;;  %p1401_p13 = scmp.lt.s32.totalorder %s1399_s10, %s1392_s15 }
  0x78   : > { %p1396_p9 = pneg %p1395_p2  ;;  %p1402_p3 = por %p1401_p13, %p1400_p4 }
  0x7a   : > { %p1403_p6 = pnand %p1402_p3, %p1396_p9 }
  0x7c   : > { %1406 = shalt.err (!%p1403_p6)
}
  0x7d   : > { %s1548_s12 = smov 64   ;;  %s1549_s20 = smov 4  }
  0x7e   : > { %1146 = dma.hbm_to_vmem [thread:$0]  (!%p1779_p12), %s1788_s5, 2048, %s1783_s22, %s1790_s11, %s1548_s12, %s1548_s12, %s1549_s20  }
  0x7f   : > { %p2001_p8 = scmp.ne.s32.totalorder %s1993_s30, 0 }
  0x80   : > { %s268_s28 = sand.u32 (!%p2001_p8), 1, %s1525_s29   ;;  %p2002_p7 = scmp.ne.s32.totalorder (!%p2001_p8), %s1986_s19, 0 }
  0x81   : > { %266 = sbr.rel (%p2001_p8) target bundleno = 630 (0x276), region = 36  ;;  %s1027_s9 = sshll.u32 (!%p2001_p8), %s268_s28, 8 }
  0x82   : > { %s269_s14 = scalar_lea.sflag (!%p2001_p8), [#allocation6], %s268_s28  ;;  %s1814_s18 = scalar_lea.vmem (!%p2001_p8), [#allocation5], %s1027_s9 }
  0x86   : > { %1484 = dma.done.wait (%p2002_p7), %s269_s14, 4096  }
  0x87   : > { %1486 = vsyncadd (%p2002_p7), %s269_s14, 4294963200  ;;  %s277_s25 = sand.u32 1, %s1513_s26   ;;  %p2003_p6 = scmp.ne.s32.totalorder %s1996_s13, 0 }
  0x88   : > { %s1028_s0 = sshll.u32 %s277_s25, 7  ;;  %s278_s22 = scalar_lea.sflag [#allocation9], %s277_s25 }
  0x89   : > { %s1821_s5 = scalar_lea.vmem [#allocation8], %s1028_s0 }
  0x8a   : > { %1488 = dma.done.wait (%p2003_p6), %s278_s22, 2048  }
  0x8b   : > { %1490 = vsyncadd (%p2003_p6), %s278_s22, 4294965248  ;;  %v1550_v0 = vmov 0   ;;  %s1030_s30 = sshll.u32 %s1533_s6, 1  ;;  %v1258_v1 = vld [vmem:[%s1814_s18 + $0xe4] ss:$16 sps:$4 sm:$0xff]   ;;  %v1307_v34 = vld [vmem:[%s1821_s5 + $0x78] sm:$0xff]  }
  0x8c   : > { %608 = vmatprep.mubr.bf16.mxu0 %v1550_v0  ;;  %651 = vmatprep.mubr.bf16.mxu1 %v1550_v0  ;;  %p322_p12 = scmp.lt.s32.totalorder %s1030_s30, 17  ;;  %v1260_v2 = vld [vmem:[%s1814_s18 + $0xe0] ss:$16 sps:$4 sm:$0xff]   ;;  %v1261_v3 = vld [vmem:[%s1814_s18 + $0xc4] ss:$16 sps:$4 sm:$0xff]   ;;  %v1308_v35 = vld [vmem:[%s1821_s5 + $0x38] sm:$0xff]  }
  0x8d   : > { %1257 = vset.pattern.permute.xlu0 %v1550_v0  ;;  %576 = vmatprep.subr.bf16.mxu0 %v1258_v1  ;;  %v1263_v4 = vld [vmem:[%s1814_s18 + $0xc0] ss:$16 sps:$4 sm:$0xff]   ;;  %v1264_v5 = vld [vmem:[%s1814_s18 + $0xa4] ss:$16 sps:$4 sm:$0xff]   ;;  %v1281_v9 = vld [vmem:[%s1814_s18 + $0xec] ss:$16 sps:$4 sm:$0xff]  }
  0x8e   : > { %577 = vmatpush1.bf16.msra.mxu0 %v1260_v2  ;;  %s2034_s30 = smov (!%p322_p12, %s1030_s30), 17  ;;  %v1266_v6 = vld [vmem:[%s1814_s18 + $0xa0] ss:$16 sps:$4 sm:$0xff]   ;;  %v1267_v7 = vld [vmem:[%s1814_s18 + $0x84] ss:$16 sps:$4 sm:$0xff]   ;;  %619 = vmatprep.subr.bf16.mxu1 %v1281_v9  ;;  %v1311_v38 = vld [vmem:[%s1821_s5 + $0x68] sm:$0xff]  }
  0x8f   : > { %578 = vmatprep.subr.bf16.mxu0 %v1261_v3  ;;  %s1031_s19 = sshll.u32 %s2034_s30, 2  ;;  %v1269_v8 = vld [vmem:[%s1814_s18 + $0x80] ss:$16 sps:$4 sm:$0xff]   ;;  %v1284_v10 = vld [vmem:[%s1814_s18 + $0xe8] ss:$16 sps:$4 sm:$0xff]   ;;  %s1033_s16 = sshll.u32 %s2034_s30, 3 }
  0x90   : > { %s1844_s15 = scalar_lea.vmem %s1962_s1, %s1031_s19  ;;  %v1270_v11 = vld [vmem:[%s1814_s18 + $0x64] ss:$16 sps:$4 sm:$0xff]   ;;  %v1286_v12 = vld [vmem:[%s1814_s18 + $0xcc] ss:$16 sps:$4 sm:$0xff]   ;;  %620 = vmatpush1.bf16.msra.mxu1 %v1284_v10  ;;  %v1288_v13 = vld [vmem:[%s1814_s18 + $0xc8] ss:$16 sps:$4 sm:$0xff]   ;;  %s334_s12 = scalar_lea.vmem %s1965_s4, %s1033_s16 }
  0x91   : > { %v1272_v14 = vld [vmem:[%s1814_s18 + $0x60] ss:$16 sps:$4 sm:$0xff]   ;;  %621 = vmatprep.subr.bf16.mxu1 %v1286_v12  ;;  %v1289_v15 = vld [vmem:[%s1814_s18 + $0xac] ss:$16 sps:$4 sm:$0xff]   ;;  %v1273_v16 = vld [vmem:[%s1814_s18 + $0x44] ss:$16 sps:$4 sm:$0xff]  }
  0x92   : > { %579 = vmatpush1.bf16.msra.mxu0 %v1263_v4  ;;  %v1291_v17 = vld [vmem:[%s1814_s18 + $0xa8] ss:$16 sps:$4 sm:$0xff]   ;;  %v1275_v18 = vld [vmem:[%s1814_s18 + $0x40] ss:$16 sps:$4 sm:$0xff]   ;;  %v1292_v19 = vld [vmem:[%s1814_s18 + $0x8c] ss:$16 sps:$4 sm:$0xff]  }
  0x93   : > { %580 = vmatprep.subr.bf16.mxu0 %v1264_v5  ;;  %v1276_v20 = vld [vmem:[%s1814_s18 + $0x24] ss:$16 sps:$4 sm:$0xff]   ;;  %v1278_v21 = vld [vmem:[%s1814_s18 + $0x20] ss:$16 sps:$4 sm:$0xff]   ;;  %v1294_v22 = vld [vmem:[%s1814_s18 + $0x88] ss:$16 sps:$4 sm:$0xff]  }
  0x94   : > { %622 = vmatpush1.bf16.msra.mxu1 %v1288_v13  ;;  %v1279_v23 = vld [vmem:[%s1814_s18 + $0x4] ss:$16 sps:$4 sm:$0xff]   ;;  %v1295_v24 = vld [vmem:[%s1814_s18 + $0x6c] ss:$16 sps:$4 sm:$0xff]   ;;  %v1297_v25 = vld [vmem:[%s1814_s18 + $0x68] ss:$16 sps:$4 sm:$0xff]  }
  0x95   : > { %623 = vmatprep.subr.bf16.mxu1 %v1289_v15  ;;  %v1283_v26 = vld [vmem:[%s1814_s18] ss:$16 sps:$4 sm:$0xff]   ;;  %v1298_v27 = vld [vmem:[%s1814_s18 + $0x4c] ss:$16 sps:$4 sm:$0xff]   ;;  %v1300_v29 = vld [vmem:[%s1814_s18 + $0x48] ss:$16 sps:$4 sm:$0xff]  }
  0x96   : > { %581 = vmatpush1.bf16.msra.mxu0 %v1266_v6  ;;  %v1285_v28 = vld [vmem:[%s1844_s15] sm:$0xff]   ;;  %v1301_v30 = vld [vmem:[%s1814_s18 + $0x2c] ss:$16 sps:$4 sm:$0xff]   ;;  %v1303_v31 = vld [vmem:[%s1814_s18 + $0x28] ss:$16 sps:$4 sm:$0xff]   ;;  %s318_s20 = sand.u32 1, %s1501_s23  }
  0x97   : > { %582 = vmatprep.subr.bf16.mxu0 %v1267_v7  ;;  %v1304_v32 = vld [vmem:[%s1814_s18 + $0xc] ss:$16 sps:$4 sm:$0xff]   ;;  %v1306_v33 = vld [vmem:[%s1814_s18 + $0x8] ss:$16 sps:$4 sm:$0xff]   ;;  %v1309_v36 = vld [vmem:[%s1821_s5 + $0x70] sm:$0xff]   ;;  %s1029_s28 = sshll.u32 %s318_s20, 3 }
  0x98   : > { %624 = vmatpush1.bf16.msra.mxu1 %v1291_v17  ;;  %v1310_v37 = vld [vmem:[%s1821_s5 + $0x30] sm:$0xff]   ;;  %v1312_v39 = vld [vmem:[%s1821_s5 + $0x28] sm:$0xff]   ;;  %v1313_v40 = vld [vmem:[%s1821_s5 + $0x60] sm:$0xff]   ;;  %s1098_s9 = sshll.u32 %s1533_s6, 7  ;;  %s320_s14 = scalar_lea.vmem [#allocation10], %s1029_s28 }
  0x99   : > { %625 = vmatprep.subr.bf16.mxu1 %v1292_v19  ;;  %v1314_v41 = vld [vmem:[%s1821_s5 + $0x20] sm:$0xff]   ;;  %v1315_v42 = vld [vmem:[%s1821_s5 + $0x58] sm:$0xff]   ;;  %v1317_v44 = vld [vmem:[%s1821_s5 + $0x50] sm:$0xff]   ;;  %s882_s18 = sshll.u32 %s320_s14, 4  ;;  %s2004_s22 = sld [smem:[#allocation26_spill]]  ;;  %s1896_s18 = int_to_ptr.vmem [resolvable:$true] %s882_s18 }
  0x9a   : > { %583 = vmatpush1.bf16.msra.mxu0 %v1269_v8  ;;  %v1316_v43 = vld [vmem:[%s1821_s5 + $0x18] sm:$0xff]   ;;  %v1318_v45 = vld [vmem:[%s1821_s5 + $0x10] sm:$0xff]   ;;  %v1319_v46 = vld [vmem:[%s1821_s5 + $0x48] sm:$0xff]   ;;  %s1898_s30 = scalar_lea.sflag [#allocation7], %s318_s20  ;;  %s1407_s6 = scalar_lea.vmem %s1896_s18, 128 }
  0x9b   : > { %584 = vmatprep.subr.bf16.mxu0 %v1270_v11  ;;  %v1320_v47 = vld [vmem:[%s1821_s5 + $0x8] sm:$0xff]   ;;  %v1321_v48 = vld [vmem:[%s1821_s5 + $0x40] sm:$0xff]   ;;  %p1408_p10 = scmp.ne.s32.totalorder %s1896_s18, %s1407_s6  ;;  %p2005_p11 = scmp.ne.s32.totalorder %s1988_s21, 0 }
  0x9c   : > { %626 = vmatpush1.bf16.msra.mxu1 %v1294_v22  ;;  %v1322_v49 = vld [vmem:[%s1821_s5] sm:$0xff]   ;;  %v845_v51 = vld [vmem:[%s334_s12 + $0x8] sm:$0xff]  ;;  %s1551_s19 = smov [#allocation10]  }
  0x9d   : > { %627 = vmatprep.subr.bf16.mxu1 %v1295_v24  ;;  %v844_v50 = vld [vmem:[%s334_s12] sm:$0xff]  ;;  %p1409_p1 = pnand %p1408_p10, %p2005_p11  ;;  %s1411_s13 = sshll.u32 %s1551_s19, 4  ;;  %s1412_s13 = int_to_ptr.vmem [resolvable:$false] %s1411_s13 }
  0x9e   : > { %585 = vmatpush1.bf16.msra.mxu0 %v1272_v14  ;;  %848 = vperm.xlu0 %1257, %v844_v50   ;;  %s1413_s11 = scalar_lea.vmem %s1412_s13, 256  ;;  %p1414_p0 = scmp.lt.s32.totalorder %s1896_s18, %s1412_s13 }
  0x9f   : > { %586 = vmatprep.subr.bf16.mxu0 %v1273_v16  ;;  %s1894_s5 = scalar_lea.hbm %s2004_s22, %s1098_s9  ;;  %p1410_p5 = pneg %p1409_p1 }
  0xa0   : > { %628 = vmatpush1.bf16.msra.mxu1 %v1297_v25  ;;  %p1415_p2 = scmp.lt.s32.totalorder %s1413_s11, %s1407_s6 }
  0xa1   : > { %629 = vmatprep.subr.bf16.mxu1 %v1298_v27 }
  0xa2   : > { %587 = vmatpush1.bf16.msra.mxu0 %v1275_v18  ;;  %853 = vperm.xlu0 %1257, %v845_v51   ;;  %p1416_p9 = por %p1415_p2, %p1414_p0 }
  0xa3   : > { %588 = vmatprep.subr.bf16.mxu0 %v1276_v20 }
  0xa4   : > { %630 = vmatpush1.bf16.msra.mxu1 %v1300_v29  ;;  %p1417_p4 = pnand %p1416_p9, %p1410_p5 }
  0xa5   : > { %631 = vmatprep.subr.bf16.mxu1 %v1301_v30 }
  0xa6   : > { %589 = vmatpush1.bf16.msra.mxu0 %v1278_v21 }
  0xa7   : > { %590 = vmatprep.subr.bf16.mxu0 %v1279_v23 }
  0xa8   : > { %632 = vmatpush1.bf16.msra.mxu1 %v1303_v31 }
  0xa9   : > { %633 = vmatprep.subr.bf16.mxu1 %v1304_v32 }
  0xaa   : > { %591 = vmatpush1.bf16.msra.mxu0 %v1283_v26 }
  0xab   : > { %1104 = vmatprep.subr.bf16.mxu0 %v1307_v34 }
  0xac   : > { %634 = vmatpush1.bf16.msra.mxu1 %v1306_v33 }
  0xad   : > { %609 = vmatmul.mubr.bf16.vlgmr.msra.gmra.mxu0 %v1285_v28 }
  0xae   : > { %1105 = vmatpush3.bf16.msra.mxu0 %v1308_v35 }
  0xaf   : > { %652 = vmatmul.mubr.bf16.vlgmr.msra.gmra.mxu1 %v1285_v28  ;;  %1106 = vmatprep.subr.bf16.mxu0 %v1309_v36 }
  0xb2   : > { %1107 = vmatpush3.bf16.msra.mxu0 %v1310_v37 }
  0xb3   : > { %1108 = vmatprep.subr.bf16.mxu0 %v1311_v38 }
  0xb6   : > { %1109 = vmatpush3.bf16.msra.mxu0 %v1312_v39 }
  0xb7   : > { %1110 = vmatprep.subr.bf16.mxu0 %v1313_v40 }
  0xba   : > { %1111 = vmatpush3.bf16.msra.mxu0 %v1314_v41 }
  0xbb   : > { %1112 = vmatprep.subr.bf16.mxu0 %v1315_v42 }
  0xbe   : > { %1113 = vmatpush3.bf16.msra.mxu0 %v1316_v43 }
  0xbf   : > { %1114 = vmatprep.subr.bf16.mxu0 %v1317_v44 }
  0xc2   : > { %1115 = vmatpush3.bf16.msra.mxu0 %v1318_v45 }
  0xc3   : > { %1116 = vmatprep.subr.bf16.mxu0 %v1319_v46 }
  0xc6   : > { %1117 = vmatpush3.bf16.msra.mxu0 %v1320_v47 }
  0xc7   : > { %1118 = vmatprep.subr.bf16.mxu0 %v1321_v48 }
  0xca   : > { %1119 = vmatpush3.bf16.msra.mxu0 %v1322_v49 }
 0x119   : > { %v849_v23 = vpop.permute.xlu0 %848 }
 0x11d   : > { %v854_v29 = vpop.permute.xlu0 %853 }
 0x16d   : > { %v610_v52 = vpop.f32.mrf.mxu0 }
 0x16e   : > { %v1067_v53 = vmul.f32 -1.442695, %v610_v52 }
 0x16f   : > { %v612_v54 = vpop.f32.mrf.mxu0  ;;  %v653_v4 = vpop.f32.mrf.mxu1 }
 0x170   : > { %1323 = vpow2.f32 %v1067_v53  ;;  %v1068_v55 = vmul.f32 -1.442695, %v612_v54 }
 0x171   : > { %v614_v56 = vpop.f32.mrf.mxu0  ;;  %v655_v5 = vpop.f32.mrf.mxu1 }
 0x172   : > { %1325 = vpow2.f32 %v1068_v55  ;;  %v1069_v57 = vmul.f32 -1.442695, %v614_v56 }
 0x173   : > { %v616_v58 = vpop.f32.mrf.mxu0  ;;  %v657_v9 = vpop.f32.mrf.mxu1 }
 0x174   : > { %1327 = vpow2.f32 %v1069_v57  ;;  %v1070_v59 = vmul.f32 -1.442695, %v616_v58 }
 0x175   : > { %v659_v16 = vpop.f32.mrf.mxu1 }
 0x176   : > { %1329 = vpow2.f32 %v1070_v59 }
 0x17d   : > { %v1324_v60 = vpop.eup %1323 }
 0x17e   : > { %v674_v62 = vadd.f32 1.0, %v1324_v60 }
 0x17f   : > { %v1326_v61 = vpop.eup %1325 }
 0x180   : > { %v675_v63 = vadd.f32 1.0, %v1326_v61 }
 0x181   : > { %v1328_v0 = vpop.eup %1327 }
 0x182   : > { %1331 = vrcp.f32 %v675_v63  ;;  %v676_v1 = vadd.f32 1.0, %v1328_v0 }
 0x183   : > { %v1330_v2 = vpop.eup %1329  ;;  %1333 = vrcp.f32 %v674_v62 }
 0x184   : > { %1335 = vrcp.f32 %v676_v1  ;;  %v677_v3 = vadd.f32 1.0, %v1330_v2 }
 0x186   : > { %1337 = vrcp.f32 %v677_v3 }
 0x18f   : > { %v1332_v6 = vpop.eup %1331 }
 0x190   : > { %v1334_v7 = vpop.eup %1333  ;;  %v687_v10 = vmul.f32 %v1332_v6, %v612_v54 }
 0x191   : > { %v1336_v8 = vpop.eup %1335  ;;  %v686_v13 = vmul.f32 %v1334_v7, %v610_v52 }
 0x192   : > { %v688_v11 = vmul.f32 %v1336_v8, %v614_v56  ;;  %v691_v17 = vmul.f32 %v687_v10, %v655_v5 }
 0x193   : > { %v1338_v12 = vpop.eup %1337  ;;  %v690_v19 = vmul.f32 %v686_v13, %v653_v4 }
 0x194   : > { %v689_v14 = vmul.f32 %v1338_v12, %v616_v58  ;;  %v692_v15 = vmul.f32 %v688_v11, %v657_v9 }
 0x196   : > { %v693_v18 = vmul.f32 %v689_v14, %v659_v16  ;;  %v696_v21 = vpack.c.bf16 %v692_v15, %v690_v19 }
 0x198   : > { %v697_v20 = vpack.c.bf16 %v693_v18, %v691_v17 }
 0x19a   : > { %826 = vmatprep.mubr.bf16.mxu0 %v697_v20 }
 0x19b   : > { %827 = vmatmul.mubr.bf16.vlgmr.msra.gmra.mxu0 %v696_v21 }
 0x25b   : > { %v1120_v22 = vpop.f32.mrf.mxu0 }
 0x25d   : > { %v1121_v24 = vpop.f32.mrf.mxu0 }
 0x25e   : > { %v1122_v26 = vadd.f32 %v1121_v24, %v1120_v22 }
 0x25f   : > { %v1123_v25 = vpop.f32.mrf.mxu0 }
 0x260   : > { %v856_v30 = vmul.f32 %v1122_v26, %v849_v23 }
 0x261   : > { %v1124_v27 = vpop.f32.mrf.mxu0 }
 0x262   : > { %v1125_v28 = vadd.f32 %v1124_v27, %v1123_v25 }
 0x264   : > { %v857_v31 = vmul.f32 %v1125_v28, %v854_v29 }
 0x266   : > { %v1102_v32 = vpack.c.bf16 %v857_v31, %v856_v30 }
 0x268   : > { %1103 = vst [vmem:[%s320_s14] sm:$0xff] %v1102_v32  }
 0x269   : > { %1420 = shalt.err (!%p1417_p4)
}
 0x26a   : > { %s1421_s15 = scalar_lea.hbm %s1894_s5, 128  ;;  %s1425_s10 = scalar_lea.hbm %s2004_s22, 1152 }
 0x26b   : > { %p1422_p13 = scmp.ne.s32.totalorder %s1894_s5, %s1421_s15  ;;  %p1426_p7 = scmp.lt.s32.totalorder %s1894_s5, %s2004_s22 }
 0x26c   : > { %p1427_p6 = scmp.lt.s32.totalorder %s1425_s10, %s1421_s15 }
 0x26d   : > { %p1423_p3 = pnand %p1422_p13, %p2005_p11 }
 0x26e   : > { %p1428_p12 = por %p1427_p6, %p1426_p7 }
 0x26f   : > { %p1424_p8 = pneg %p1423_p3 }
 0x271   : > { %p1429_p10 = pnand %p1428_p12, %p1424_p8 }
 0x273   : > { %1432 = shalt.err (!%p1429_p10)
}
 0x274   : > { %s1552_s28 = smov 64   ;;  %s1553_s9 = smov 4  }
 0x275   : > { %1134 = dma.vmem_to_hbm [thread:$0]  (%p2005_p11), %s1896_s18, 128, %s1894_s5, %s1898_s30, %s1552_s28, %s1552_s28, %s1553_s9  }
 0x276 PF: > { %s2006_s14 = sld [smem:[#allocation19_spill]]  ;;  %p1152_p1 = scmp.ge.s32.totalorder %s1541_s8, 2 }
 0x277   : > { %s2007_s25 = sld [smem:[#allocation24_spill]] }
 0x27c   : > { %s897_s0 = sand.u32 1, %s2006_s14  }
 0x27d   : > { %p2008_p5 = scmp.ne.s32.totalorder %s2007_s25, 0  ;;  %s898_s6 = scalar_lea.sflag [#allocation7], %s897_s0 }
 0x27f   : > { %p1148_p0 = pnand %p1152_p1, %p2008_p5 }
 0x281   : > { %p1149_p2 = pneg %p1148_p0 }
 0x283   : > { %1492 = dma.done.wait (%p1149_p2), %s898_s6, 128  }
 0x284   : > { %1494 = vsyncadd (%p1149_p2), %s898_s6, 4294967168  ;;  %s30_s8 = sadd.s32 1, %s1541_s8   ;;  %s2009_s19 = sld [smem:[#allocation20_spill]] }
 0x285   : > { %p27_p9 = scmp.ge.s32.totalorder %s30_s8, 11   ;;  %s2010_s24 = sld [smem:[#allocation23_spill]] }
 0x286   : > { %s2011_s21 = sld [smem:[#allocation21_spill]]  ;;  %s2014_s0 = smov %s1501_s23 }
 0x287   : > { %s2012_s30 = sld [smem:[#allocation25_spill]]  ;;  %s2016_s25 = smov %s1513_s26 }
 0x288   : > { %s2013_s18 = sld [smem:[#allocation22_spill]]  ;;  %s2017_s26 = smov %s1517_s27 }
 0x289   : > { %s2018_s27 = smov %s1770_s17  ;;  %s2019_s28 = smov %s1525_s29 }
 0x28a   : > { %s2015_s23 = smov %s2009_s19  ;;  %s2021_s6 = smov %s1537_s7 }
 0x28b   :  { %29 = sbr.rel (!%p27_p9) target bundleno = 26 (0x1a), region = 108 }
 0x28c   : > { %s2020_s29 = smov %s2011_s21 }
 0x28e   : > { %s2022_s7 = smov %s2013_s18 }
 0x290   :  { %903 = vsyncpa [#allocation6], 1 }
 0x291   :  { %905 = vsyncpa [#allocation6 + $0x1], 1 }
 0x292   :  { %906 = vsyncpa [#allocation9], 1 }
 0x293   :  { %908 = vsyncpa [#allocation9 + $0x1], 1 }
 0x294   :  { %909 = vsyncpa [#allocation7], 1 }
 0x295   :  { %911 = vsyncpa [#allocation7 + $0x1], 1 }

</bundles_post_ra>
